<compile_context>
chip_gen: v7x
topology: tpu7x:2x2x1
jax: 0.10.0
libtpu: 0.0.40
codegen_flags: <defaults>
</compile_context>

<pallas_src>
import functools

import jax
import jax.numpy as jnp
import numpy as np
from jax.experimental import pallas as pl
from jax.experimental.pallas import tpu as pltpu


def _round_up(x, m):
    return ((x + m - 1) // m) * m


def _scatter_kernel(key_ref, feats_ref, out_ref, acc_ref, *, s_tile, s_stride):
    """One (batch, spatial-tile, pillar-tile) grid point.

    key_ref  : [1, p_tile] int32   key = batch * s_stride + (y*nx + x), -1 pad
    feats_ref: [p_tile, C] float
    out_ref  : [1, s_tile, C] float   (resident across the k axis)
    acc_ref  : [s_tile, C] float32 VMEM accumulator
    """
    b = pl.program_id(0)
    st = pl.program_id(1)
    k = pl.program_id(2)

    @pl.when(k == 0)
    def _():
        acc_ref[...] = jnp.zeros_like(acc_ref)

    keys = key_ref[...]                                  # [1, p_tile] int32
    p_tile = keys.shape[1]

    # col id of each output row of this tile, in "global key" space.
    tile_base = b * s_stride + st * s_tile               # scalar int32
    col_ids = jax.lax.broadcasted_iota(jnp.int32, (s_tile, p_tile), 0) + tile_base

    # onehot_T[s, p] = 1 iff pillar p lands in (batch b, spatial col st*s_tile+s)
    onehot_t = (col_ids == keys).astype(feats_ref.dtype)  # [s_tile, p_tile]

    # [s_tile, C] += onehot_T @ feats   (contract over the pillar axis, MXU)
    acc_ref[...] += jax.lax.dot_general(
        onehot_t, feats_ref[...],
        dimension_numbers=(((1,), (0,)), ((), ())),
        preferred_element_type=jnp.float32,
    )

    @pl.when(k == pl.num_programs(2) - 1)
    def _():
        out_ref[...] = acc_ref[...][None].astype(out_ref.dtype)


def point_pillar_scatter(pillar_features, voxel_coords, *, nx, ny,
                         num_bev_features, batch_size):
    """Pallas equivalent of PointPillarScatter.forward.

    pillar_features: [P, C] float
    voxel_coords   : [P, 4] int, columns (x, y, z, batch_idx)
    batch_size     : static int (pass explicitly; deriving it from
                     coords[:, -1].max() forces a host sync and mis-sizes the
                     output if a batch has zero pillars).
    returns spatial_features: [batch_size, C, ny, nx]
    """
    P, C = pillar_features.shape
    assert C == num_bev_features
    S = nx * ny

    # Tile sizes: spatial tile 256-512 lanes (128-aligned), pillar tile <=512.
    s_tile = min(512, _round_up(S, 128))
    S_pad = _round_up(S, s_tile)
    p_tile = min(512, _round_up(P, 128))
    P_pad = _round_up(P, p_tile)

    # Precompute the fused (batch, spatial) key on the XLA side; keep it
    # lane-major [1, P_pad] so the kernel block is tiny.  Pad pillars -> -1.
    coords = voxel_coords.astype(jnp.int32)
    lin = coords[:, 1] * nx + coords[:, 0]                # y*nx + x
    key = coords[:, -1] * S_pad + lin                     # [P]
    key = jnp.pad(key, (0, P_pad - P), constant_values=-1).reshape(1, P_pad)
    feats = jnp.pad(pillar_features, ((0, P_pad - P), (0, 0)))

    kernel = functools.partial(_scatter_kernel, s_tile=s_tile, s_stride=S_pad)

    grid = (batch_size, S_pad // s_tile, P_pad // p_tile)

    out = pl.pallas_call(
        kernel,
        out_shape=jax.ShapeDtypeStruct((batch_size, S_pad, C),
                                       pillar_features.dtype),
        grid_spec=pltpu.PrefetchScalarGridSpec(
            num_scalar_prefetch=0,
            grid=grid,
            in_specs=[
                pl.BlockSpec((1, p_tile), lambda b, s, k: (0, k)),    # keys
                pl.BlockSpec((p_tile, C), lambda b, s, k: (k, 0)),    # feats
            ],
            out_specs=pl.BlockSpec((1, s_tile, C), lambda b, s, k: (b, s, 0)),
            scratch_shapes=[pltpu.VMEM((s_tile, C), jnp.float32)],
        ),
        compiler_params=pltpu.CompilerParams(
            dimension_semantics=("parallel", "parallel", "arbitrary")),
    )(key, feats)

    # NHWC-ish [B, S, C] -> NCHW [B, C, ny, nx]; drop spatial padding.
    out = out[:, :S, :]
    out = jnp.transpose(out, (0, 2, 1))
    return out.reshape(batch_size, num_bev_features, ny, nx)


def _reference_numpy(pillar_features, voxel_coords, nx, ny, num_bev_features,
                     batch_size):
    """Plain numpy re-implementation of the torch forward for verification."""
    feats = np.asarray(pillar_features)
    coords = np.asarray(voxel_coords)
    out = []
    for b in range(batch_size):
        canvas = np.zeros((num_bev_features, nx * ny), dtype=feats.dtype)
        m = coords[:, -1] == b
        this = coords[m]
        idx = (this[:, 1] * nx + this[:, 0]).astype(np.int64)
        canvas[:, idx] = feats[m].T
        out.append(canvas)
    return np.stack(out, 0).reshape(batch_size, num_bev_features, ny, nx)


if __name__ == "__main__":
    # Config (mirrors cfg in __init__): pc_range / voxel_size => nx=16, ny=16.
    pc_range = [0.0, 0.0, -3.0, 16.0, 16.0, 1.0]
    voxel_size = [1.0, 1.0, 4.0]
    num_bev_features = 16
    nx = int((pc_range[3] - pc_range[0]) / voxel_size[0])   # 16
    ny = int((pc_range[4] - pc_range[1]) / voxel_size[1])   # 16

    key = jax.random.PRNGKey(0)
    k_feat, k_perm0, k_perm1 = jax.random.split(key, 3)

    pillars_per_batch = 16
    batch_size = 2                     # passed explicitly (see wrapper docstring)
    P = pillars_per_batch * batch_size

    # Unique spatial locations per batch (PointPillars voxel coords are unique).
    lin0 = jax.random.permutation(k_perm0, nx * ny)[:pillars_per_batch]
    lin1 = jax.random.permutation(k_perm1, nx * ny)[:pillars_per_batch]
    lin = jnp.concatenate([lin0, lin1]).astype(jnp.int32)            # [P]
    batch_col = jnp.concatenate([
        jnp.zeros((pillars_per_batch,), jnp.int32),
        jnp.ones((pillars_per_batch,), jnp.int32),
    ])
    xs = lin % nx
    ys = lin // nx
    zs = jnp.zeros_like(xs)
    voxel_coords = jnp.stack([xs, ys, zs, batch_col], axis=1)        # [P, 4] int32

    pillar_features = jax.random.normal(k_feat, (P, num_bev_features),
                                        dtype=jnp.float32)           # [P, C]

    spatial_features = point_pillar_scatter(
        pillar_features, voxel_coords,
        nx=nx, ny=ny, num_bev_features=num_bev_features, batch_size=batch_size)
    spatial_features = jax.block_until_ready(spatial_features)

    ref = _reference_numpy(pillar_features, voxel_coords, nx, ny,
                           num_bev_features, batch_size)
    np.testing.assert_allclose(np.asarray(spatial_features), ref,
                               rtol=1e-6, atol=1e-6)
    print("KERNEL_OK")
</pallas_src>

<mosaic_0001>
module attributes {stable_mosaic.version = 11 : i64} {
  func.func @_scatter_kernel(%arg0: i32, %arg1: i32, %arg2: i32, %arg3: memref<1x128xi32, #tpu.memory_space<vmem>>, %arg4: memref<128x16xf32, #tpu.memory_space<vmem>>, %arg5: memref<1x256x16xf32, #tpu.memory_space<vmem>>, %arg6: memref<256x16xf32, #tpu.memory_space<vmem>>) attributes {dimension_semantics = [#tpu.dimension_semantics<parallel>, #tpu.dimension_semantics<parallel>, #tpu.dimension_semantics<arbitrary>], iteration_bounds = array<i64: 2, 1, 1>, scalar_prefetch = 0 : i64, scratch_operands = 1 : i64, tpu.core_type = #tpu.core_type<tc>, window_params = [{transform_indices = @transform_0, window_bounds = array<i64: 1, 128>}, {transform_indices = @transform_1, window_bounds = array<i64: 128, 16>}, {transform_indices = @transform_2, window_bounds = array<i64: 1, 256, 16>}]} {
    %c0_i32 = arith.constant 0 : i32
    %0 = arith.cmpi eq, %arg2, %c0_i32 : i32
    %1 = arith.extui %0 : i1 to i32
    %c0_i32_0 = arith.constant 0 : i32
    %2 = arith.cmpi ne, %1, %c0_i32_0 : i32
    scf.if %2 {
      %cst_11 = arith.constant 0.000000e+00 : f32
      %22 = vector.broadcast %cst_11 : f32 to vector<256x16xf32>
      %c0_12 = arith.constant 0 : index
      %c0_13 = arith.constant 0 : index
      %23 = vector.load %arg6[%c0_12, %c0_13] : memref<256x16xf32, #tpu.memory_space<vmem>>, vector<256x16xf32>
      tpu.vector_store %arg6[%c0_12, %c0_13], %22 {strides = array<i32>} : memref<256x16xf32, #tpu.memory_space<vmem>>, vector<256x16xf32>,
    } else {
    }
    %c0 = arith.constant 0 : index
    %c0_1 = arith.constant 0 : index
    %3 = vector.load %arg3[%c0, %c0_1] : memref<1x128xi32, #tpu.memory_space<vmem>>, vector<1x128xi32>
    %c256_i32 = arith.constant 256 : i32
    %4 = arith.muli %arg0, %c256_i32 : i32
    %c256_i32_2 = arith.constant 256 : i32
    %5 = arith.muli %arg1, %c256_i32_2 : i32
    %6 = arith.addi %4, %5 : i32
    %7 = tpu.iota {dimensions = array<i32: 0>} : vector<256x128xi32>
    %8 = vector.broadcast %6 : i32 to vector<256x128xi32>
    %9 = arith.addi %7, %8 : vector<256x128xi32>
    %10 = vector.broadcast %3 : vector<1x128xi32> to vector<256x128xi32>
    %11 = arith.cmpi eq, %9, %10 : vector<256x128xi32>
    %12 = arith.extui %11 : vector<256x128xi1> to vector<256x128xi32>
    %13 = arith.sitofp %12 : vector<256x128xi32> to vector<256x128xf32>
    %c0_3 = arith.constant 0 : index
    %c0_4 = arith.constant 0 : index
    %14 = vector.load %arg6[%c0_3, %c0_4] : memref<256x16xf32, #tpu.memory_space<vmem>>, vector<256x16xf32>
    %c0_5 = arith.constant 0 : index
    %c0_6 = arith.constant 0 : index
    %15 = vector.load %arg4[%c0_5, %c0_6] : memref<128x16xf32, #tpu.memory_space<vmem>>, vector<128x16xf32>
    %cst = arith.constant dense<0.000000e+00> : vector<256x16xf32>
    %16 = tpu.matmul %13, %15, %cst {dimension_numbers = #tpu.dot_dimension_numbers<[1], [0], [0], [1], [0, 0, 1, 1], [], []>} : vector<256x128xf32>, vector<128x16xf32>, vector<256x16xf32> -> vector<256x16xf32>
    %17 = arith.addf %14, %16 : vector<256x16xf32>
    %c0_7 = arith.constant 0 : index
    %c0_8 = arith.constant 0 : index
    %18 = vector.load %arg6[%c0_7, %c0_8] : memref<256x16xf32, #tpu.memory_space<vmem>>, vector<256x16xf32>
    tpu.vector_store %arg6[%c0_7, %c0_8], %17 {strides = array<i32>} : memref<256x16xf32, #tpu.memory_space<vmem>>, vector<256x16xf32>,
    %c0_i32_9 = arith.constant 0 : i32
    %19 = arith.cmpi eq, %arg2, %c0_i32_9 : i32
    %20 = arith.extui %19 : i1 to i32
    %c0_i32_10 = arith.constant 0 : i32
    %21 = arith.cmpi ne, %20, %c0_i32_10 : i32
    scf.if %21 {
      %c0_11 = arith.constant 0 : index
      %c0_12 = arith.constant 0 : index
      %22 = vector.load %arg6[%c0_11, %c0_12] : memref<256x16xf32, #tpu.memory_space<vmem>>, vector<256x16xf32>
      %23 = vector.shape_cast %22 : vector<256x16xf32> to vector<1x256x16xf32>
      %c0_13 = arith.constant 0 : index
      %c0_14 = arith.constant 0 : index
      %c0_15 = arith.constant 0 : index
      %24 = vector.load %arg5[%c0_13, %c0_14, %c0_15] : memref<1x256x16xf32, #tpu.memory_space<vmem>>, vector<1x256x16xf32>
      tpu.vector_store %arg5[%c0_13, %c0_14, %c0_15], %23 {strides = array<i32>} : memref<1x256x16xf32, #tpu.memory_space<vmem>>, vector<1x256x16xf32>,
    } else {
    }
    return
  }
  func.func @transform_0(%arg0: i32, %arg1: i32, %arg2: i32) -> (i32, i32) {
    %c0_i32 = arith.constant 0 : i32
    %c0_i32_0 = arith.constant 0 : i32
    return %c0_i32, %arg2 : i32, i32
  }
  func.func @transform_1(%arg0: i32, %arg1: i32, %arg2: i32) -> (i32, i32) {
    %c0_i32 = arith.constant 0 : i32
    %c0_i32_0 = arith.constant 0 : i32
    return %arg2, %c0_i32 : i32, i32
  }
  func.func @transform_2(%arg0: i32, %arg1: i32, %arg2: i32) -> (i32, i32, i32) {
    %c0_i32 = arith.constant 0 : i32
    %c0_i32_0 = arith.constant 0 : i32
    return %arg0, %arg1, %c0_i32 : i32, i32, i32
  }
}

</mosaic_0001>

<bundles_post_ra>
// kernel: tpu_custom_call.1
= control target key start
LH: loop header
LB: loop body
LE: loop exit
PB: predicated region body
PF: predicated region fallthrough
CT: control target
= control target key end

     0   :  { %s1221_s9 = smov 0   ;;  %s1223_s10 = smov 0   ;;  %s1574_s0 = inlined_call_operand.vmem [shape: s32[1,128], index: 0, kind: input, shape index: {}]   ;;  %s1575_s1 = inlined_call_operand.vmem [shape: f32[128,16], index: 1, kind: input, shape index: {}]   ;;  %s1576_s2 = inlined_call_operand.vmem [shape: f32[2,256,16], index: 2, kind: output, shape index: {}]  }
   0x1   :  { %s1225_s11 = smov 0  }
   0x2 LB: > { %s31_s12 = sadd.s32 1, %s1198_s10  ;;  %p906_p0 = scmp.ge.s32.totalorder %s1202_s11, 1  ;;  %s1202_s11 = sphi %s1225_s11, %s12_s11   ;;  %s1198_s10 = sphi %s1223_s10, %s1578_s10   ;;  %s1194_s9 = sphi %s1221_s9, %s1577_s9  }
   0x3   : > { %p33_p1 = scmp.ge.s32.totalorder %s31_s12, 2  ;;  %p142_p2 = scmp.lt.s32.totalorder %s1202_s11, 3 }
   0x5   : > { %s1580_s12 = smov (%p33_p1, %s31_s12), 0  ;;  %p143_p3 = pnand %p906_p0, %p142_p2 }
   0x6   : > { %v429_v0 = vld [vmem:[%s1575_s1] sm:$0xff] (!%p143_p3)  ;;  %v430_v1 = vld [vmem:[%s1575_s1 + $0x8] sm:$0xff] (!%p143_p3)  ;;  %v431_v2 = vld [vmem:[%s1575_s1 + $0x10] sm:$0xff] (!%p143_p3)  ;;  %s909_s19 = sshll.u32 (!%p143_p3), %s1194_s9, 8  ;;  %v231_v3 = vlaneseq (!%p143_p3)  ;;  %vm194_vm0 = vcmask (!%p143_p3), 130048   ;;  %v1204_v11 = vmov (!%p143_p3), 0.0  }
   0x7   : > { %146 = sbr.rel (%p143_p3) target bundleno = 296 (0x128), region = 28  ;;  %v1106_v4 = vpack.c.bf16 (!%p143_p3), %v430_v1, %v429_v0  ;;  %v432_v5 = vld [vmem:[%s1575_s1 + $0x18] sm:$0xff] (!%p143_p3)  ;;  %v1254_v6 = vstv (!%p143_p3), %s909_s19  ;;  %v433_v8 = vld [vmem:[%s1575_s1 + $0x20] sm:$0xff] (!%p143_p3)  ;;  %v434_v9 = vld [vmem:[%s1575_s1 + $0x28] sm:$0xff] (!%p143_p3)  ;;  %196 = vst.msk [vmem:[#allocation2 + $0x8] sm:$0xff] (!%p143_p3), %vm194_vm0, %v1204_v11  ;;  %v1205_v19 = vmov (!%p143_p3), 1.0  }
   0x8   : > { %v1110_v7 = vpack.c.bf16 (!%p143_p3), %v432_v5, %v431_v2  ;;  %v1262_v10 = vshrl.u32 (!%p143_p3), %v231_v3, 7  ;;  %195 = vst.msk [vmem:[#allocation2] sm:$0xff] (!%p143_p3), %vm194_vm0, %v1204_v11  ;;  %197 = vst.msk [vmem:[#allocation2 + $0x10] sm:$0xff] (!%p143_p3), %vm194_vm0, %v1204_v11  ;;  %v1114_v14 = vpack.c.bf16 (!%p143_p3), %v434_v9, %v433_v8  ;;  %v1302_v15 = vld [vmem:[%s1574_s0] ss:$0 sm:$0xff] (!%p143_p3)  ;;  %v435_v16 = vld [vmem:[%s1575_s1 + $0x30] sm:$0xff] (!%p143_p3) }
   0x9   : > { %198 = vst.msk [vmem:[#allocation2 + $0x18] sm:$0xff] (!%p143_p3), %vm194_vm0, %v1204_v11  ;;  %199 = vst.msk [vmem:[#allocation2 + $0x20] sm:$0xff] (!%p143_p3), %vm194_vm0, %v1204_v11  ;;  %1107 = vmatprep.subr.bf16.mxu0 (!%p143_p3), %v1106_v4  ;;  %1138 = vmatprep.subr.bf16.mxu1 (!%p143_p3), %v1106_v4  ;;  %v436_v17 = vld [vmem:[%s1575_s1 + $0x38] sm:$0xff] (!%p143_p3)  ;;  %v437_v21 = vld [vmem:[%s1575_s1 + $0x40] sm:$0xff] (!%p143_p3)  ;;  %p181_p4 = scmp.lt.s32.totalorder (!%p143_p3), %s1194_s9, 1 }
   0xa   : > { %200 = vst.msk [vmem:[#allocation2 + $0x28] sm:$0xff] (!%p143_p3), %vm194_vm0, %v1204_v11  ;;  %201 = vst.msk [vmem:[#allocation2 + $0x30] sm:$0xff] (!%p143_p3), %vm194_vm0, %v1204_v11  ;;  %1109 = vmatpush3.bf16.msra.mxu0 (!%p143_p3), %v1106_v4  ;;  %1146 = vmatpush3.bf16.msra.mxu1 (!%p143_p3), %v1106_v4  ;;  %v265_v12 = vadd.s32 (!%p143_p3), %v1254_v6, %v1262_v10  ;;  %v248_v13 = vadd.s32 (!%p143_p3), 128, %v1262_v10  ;;  %v1118_v20 = vpack.c.bf16 (!%p143_p3), %v436_v17, %v435_v16  ;;  %v438_v22 = vld [vmem:[%s1575_s1 + $0x48] sm:$0xff] (!%p143_p3)  ;;  %v439_v24 = vld [vmem:[%s1575_s1 + $0x50] sm:$0xff] (!%p143_p3) }
   0xb   : > { %202 = vst.msk [vmem:[#allocation2 + $0x38] sm:$0xff] (!%p143_p3), %vm194_vm0, %v1204_v11  ;;  %203 = vst.msk [vmem:[#allocation2 + $0x40] sm:$0xff] (!%p143_p3), %vm194_vm0, %v1204_v11  ;;  %1111 = vmatprep.subr.bf16.mxu0 (!%p143_p3), %v1110_v7  ;;  %1139 = vmatprep.subr.bf16.mxu1 (!%p143_p3), %v1110_v7  ;;  %v1122_v23 = vpack.c.bf16 (!%p143_p3), %v438_v22, %v437_v21  ;;  %v440_v25 = vld [vmem:[%s1575_s1 + $0x58] sm:$0xff] (!%p143_p3)  ;;  %v441_v27 = vld [vmem:[%s1575_s1 + $0x60] sm:$0xff] (!%p143_p3)  ;;  %v233_v32 = vadd.s32 (!%p143_p3), 8, %v1262_v10  ;;  %v249_v33 = vadd.s32 (!%p143_p3), 136, %v1262_v10 }
   0xc   : > { %204 = vst.msk [vmem:[#allocation2 + $0x48] sm:$0xff] (!%p143_p3), %vm194_vm0, %v1204_v11  ;;  %205 = vst.msk [vmem:[#allocation2 + $0x50] sm:$0xff] (!%p143_p3), %vm194_vm0, %v1204_v11  ;;  %vm301_vm1 = vcmp.eq.s32.totalorder (!%p143_p3), %v265_v12, %v1302_v15  ;;  %v281_v18 = vadd.s32 (!%p143_p3), %v1254_v6, %v248_v13  ;;  %v1126_v26 = vpack.c.bf16 (!%p143_p3), %v440_v25, %v439_v24  ;;  %v442_v28 = vld [vmem:[%s1575_s1 + $0x68] sm:$0xff] (!%p143_p3)  ;;  %v443_v30 = vld [vmem:[%s1575_s1 + $0x70] sm:$0xff] (!%p143_p3)  ;;  %v234_v35 = vadd.s32 (!%p143_p3), 16, %v1262_v10 }
   0xd   : > { %206 = vst.msk [vmem:[#allocation2 + $0x58] sm:$0xff] (!%p143_p3), %vm194_vm0, %v1204_v11  ;;  %207 = vst.msk [vmem:[#allocation2 + $0x60] sm:$0xff] (!%p143_p3), %vm194_vm0, %v1204_v11  ;;  %1058 = vmatprep.mubr.msk.f32.mxu0 (!%p143_p3), %vm301_vm1, %v1205_v19  ;;  %v1130_v29 = vpack.c.bf16 (!%p143_p3), %v442_v28, %v441_v27  ;;  %v444_v31 = vld [vmem:[%s1575_s1 + $0x78] sm:$0xff] (!%p143_p3)  ;;  %v250_v36 = vadd.s32 (!%p143_p3), 144, %v1262_v10  ;;  %v266_v37 = vadd.s32 (!%p143_p3), %v1254_v6, %v233_v32  ;;  %v235_v38 = vadd.s32 (!%p143_p3), 24, %v1262_v10 }
   0xe   : > { %208 = vst.msk [vmem:[#allocation2 + $0x68] sm:$0xff] %vm194_vm0, %v1204_v11  ;;  %209 = vst.msk [vmem:[#allocation2 + $0x70] sm:$0xff] %vm194_vm0, %v1204_v11  ;;  %1113 = vmatpush3.bf16.msra.mxu0 %v1110_v7  ;;  %1147 = vmatpush3.bf16.msra.mxu1 %v1110_v7  ;;  %vm317_vm2 = vcmp.eq.s32.totalorder %v281_v18, %v1302_v15  ;;  %v1134_v34 = vpack.c.bf16 %v444_v31, %v443_v30  ;;  %v251_v39 = vadd.s32 152, %v1262_v10  ;;  %s1582_s9 = smov (!%p181_p4, %s1194_s9), 1 }
   0xf   : > { %210 = vst.msk [vmem:[#allocation2 + $0x78] sm:$0xff] %vm194_vm0, %v1204_v11  ;;  %211 = vst.msk [vmem:[#allocation2 + $0x80] sm:$0xff] %vm194_vm0, %v1204_v11  ;;  %1115 = vmatprep.subr.bf16.mxu0 %v1114_v14  ;;  %1140 = vmatprep.subr.bf16.mxu1 %v1114_v14  ;;  %v282_v40 = vadd.s32 %v1254_v6, %v249_v33  ;;  %v236_v41 = vadd.s32 32, %v1262_v10  ;;  %v252_v42 = vadd.s32 160, %v1262_v10  ;;  %v237_v47 = vadd.s32 40, %v1262_v10  ;;  %v397_v33 = vld [vmem:[#allocation2] sm:$0xff] }
  0x10   : > { %212 = vst.msk [vmem:[#allocation2 + $0x88] sm:$0xff] %vm194_vm0, %v1204_v11  ;;  %213 = vst.msk [vmem:[#allocation2 + $0x90] sm:$0xff] %vm194_vm0, %v1204_v11  ;;  %1082 = vmatprep.mubr.msk.f32.mxu1 %vm317_vm2, %v1205_v19  ;;  %v267_v43 = vadd.s32 %v1254_v6, %v234_v35  ;;  %v283_v44 = vadd.s32 %v1254_v6, %v250_v36  ;;  %vm302_vm3 = vcmp.eq.s32.totalorder %v266_v37, %v1302_v15  ;;  %s977_s24 = sshll.u32 %s1582_s9, 8 }
  0x11   : > { %214 = vst.msk [vmem:[#allocation2 + $0x98] sm:$0xff] %vm194_vm0, %v1204_v11  ;;  %215 = vst.msk [vmem:[#allocation2 + $0xa0] sm:$0xff] %vm194_vm0, %v1204_v11  ;;  %v268_v45 = vadd.s32 %v1254_v6, %v235_v38  ;;  %v284_v46 = vadd.s32 %v1254_v6, %v251_v39  ;;  %vm318_vm4 = vcmp.eq.s32.totalorder %v282_v40, %v1302_v15  ;;  %v253_v50 = vadd.s32 168, %v1262_v10  ;;  %s1473_s27 = scalar_lea.vmem %s1576_s2, %s977_s24 }
  0x12   : > { %216 = vst.msk [vmem:[#allocation2 + $0xa8] sm:$0xff] %vm194_vm0, %v1204_v11  ;;  %217 = vst.msk [vmem:[#allocation2 + $0xb0] sm:$0xff] %vm194_vm0, %v1204_v11  ;;  %1117 = vmatpush3.bf16.msra.mxu0 %v1114_v14  ;;  %1148 = vmatpush3.bf16.msra.mxu1 %v1114_v14  ;;  %v269_v48 = vadd.s32 %v1254_v6, %v236_v41  ;;  %v285_v49 = vadd.s32 %v1254_v6, %v252_v42  ;;  %v238_v51 = vadd.s32 48, %v1262_v10  ;;  %v400_v42 = vld [vmem:[#allocation2 + $0x18] sm:$0xff] }
  0x13   : > { %218 = vst.msk [vmem:[#allocation2 + $0xb8] sm:$0xff] %vm194_vm0, %v1204_v11  ;;  %219 = vst.msk [vmem:[#allocation2 + $0xc0] sm:$0xff] %vm194_vm0, %v1204_v11  ;;  %1119 = vmatprep.subr.bf16.mxu0 %v1118_v20  ;;  %1141 = vmatprep.subr.bf16.mxu1 %v1118_v20  ;;  %vm303_vm5 = vcmp.eq.s32.totalorder %v267_v43, %v1302_v15  ;;  %vm319_vm6 = vcmp.eq.s32.totalorder %v283_v44, %v1302_v15  ;;  %v254_v52 = vadd.s32 176, %v1262_v10 }
  0x14   : > { %220 = vst.msk [vmem:[#allocation2 + $0xc8] sm:$0xff] %vm194_vm0, %v1204_v11  ;;  %221 = vst.msk [vmem:[#allocation2 + $0xd0] sm:$0xff] %vm194_vm0, %v1204_v11  ;;  %vm304_vm7 = vcmp.eq.s32.totalorder %v268_v45, %v1302_v15  ;;  %vm320_vm8 = vcmp.eq.s32.totalorder %v284_v46, %v1302_v15  ;;  %v270_v53 = vadd.s32 %v1254_v6, %v237_v47  ;;  %v239_v54 = vadd.s32 56, %v1262_v10 }
  0x15   : > { %222 = vst.msk [vmem:[#allocation2 + $0xd8] sm:$0xff] %vm194_vm0, %v1204_v11  ;;  %223 = vst.msk [vmem:[#allocation2 + $0xe0] sm:$0xff] %vm194_vm0, %v1204_v11  ;;  %vm305_vm9 = vcmp.eq.s32.totalorder %v269_v48, %v1302_v15  ;;  %vm321_vm10 = vcmp.eq.s32.totalorder %v285_v49, %v1302_v15  ;;  %v286_v55 = vadd.s32 %v1254_v6, %v253_v50  ;;  %v255_v56 = vadd.s32 184, %v1262_v10 }
  0x16   : > { %224 = vst.msk [vmem:[#allocation2 + $0xe8] sm:$0xff] %vm194_vm0, %v1204_v11  ;;  %225 = vst.msk [vmem:[#allocation2 + $0xf0] sm:$0xff] %vm194_vm0, %v1204_v11  ;;  %1121 = vmatpush3.bf16.msra.mxu0 %v1118_v20  ;;  %1149 = vmatpush3.bf16.msra.mxu1 %v1118_v20  ;;  %v271_v57 = vadd.s32 %v1254_v6, %v238_v51  ;;  %v287_v58 = vadd.s32 %v1254_v6, %v254_v52  ;;  %v240_v59 = vadd.s32 64, %v1262_v10 }
  0x17   : > { %226 = vst.msk [vmem:[#allocation2 + $0xf8] sm:$0xff] %vm194_vm0, %v1204_v11  ;;  %1123 = vmatprep.subr.bf16.mxu0 %v1122_v23  ;;  %1142 = vmatprep.subr.bf16.mxu1 %v1122_v23  ;;  %v256_v60 = vadd.s32 192, %v1262_v10  ;;  %vm306_vm11 = vcmp.eq.s32.totalorder %v270_v53, %v1302_v15  ;;  %v272_v61 = vadd.s32 %v1254_v6, %v239_v54  ;;  %v241_v62 = vadd.s32 72, %v1262_v10  ;;  %v414_v32 = vld [vmem:[#allocation2 + $0x88] sm:$0xff]  ;;  %v415_v44 = vld [vmem:[#allocation2 + $0x90] sm:$0xff] }
  0x18   : > { %v257_v63 = vadd.s32 200, %v1262_v10  ;;  %vm322_vm12 = vcmp.eq.s32.totalorder %v286_v55, %v1302_v15  ;;  %v288_v0 = vadd.s32 %v1254_v6, %v255_v56  ;;  %v242_v1 = vadd.s32 80, %v1262_v10  ;;  %v416_v43 = vld [vmem:[#allocation2 + $0x98] sm:$0xff]  ;;  %v402_v53 = vld [vmem:[#allocation2 + $0x28] sm:$0xff]  ;;  %v401_v55 = vld [vmem:[#allocation2 + $0x20] sm:$0xff] }
  0x19   : > { %v258_v2 = vadd.s32 208, %v1262_v10  ;;  %vm307_vm13 = vcmp.eq.s32.totalorder %v271_v57, %v1302_v15  ;;  %vm323_vm14 = vcmp.eq.s32.totalorder %v287_v58, %v1302_v15  ;;  %v273_v3 = vadd.s32 %v1254_v6, %v240_v59  ;;  %v418_v54 = vld [vmem:[#allocation2 + $0xa8] sm:$0xff]  ;;  %v417_v56 = vld [vmem:[#allocation2 + $0xa0] sm:$0xff] }
  0x1a   : > { %1125 = vmatpush3.bf16.msra.mxu0 %v1122_v23  ;;  %1150 = vmatpush3.bf16.msra.mxu1 %v1122_v23  ;;  %v289_v4 = vadd.s32 %v1254_v6, %v256_v60  ;;  %vm308_vm15 = vcmp.eq.s32.totalorder %v272_v61, %v1302_v15  ;;  %v274_v5 = vadd.s32 %v1254_v6, %v241_v62  ;;  %v243_v8 = vadd.s32 88, %v1262_v10 }
  0x1b   : > { %1127 = vmatprep.subr.bf16.mxu0 %v1126_v26  ;;  %1143 = vmatprep.subr.bf16.mxu1 %v1126_v26  ;;  %v290_v7 = vadd.s32 %v1254_v6, %v257_v63  ;;  %vm324_vm1 = vcmp.eq.s32.totalorder %v288_v0, %v1302_v15  ;;  %v275_v9 = vadd.s32 %v1254_v6, %v242_v1  ;;  %v259_v12 = vadd.s32 216, %v1262_v10  ;;  %v404_v63 = vld [vmem:[#allocation2 + $0x38] sm:$0xff] }
  0x1c   : > { %v291_v11 = vadd.s32 %v1254_v6, %v258_v2  ;;  %vm309_vm2 = vcmp.eq.s32.totalorder %v273_v3, %v1302_v15  ;;  %v244_v13 = vadd.s32 96, %v1262_v10  ;;  %v260_v14 = vadd.s32 224, %v1262_v10  ;;  %v420_v0 = vld [vmem:[#allocation2 + $0xb8] sm:$0xff] }
  0x1d   : > { %v276_v16 = vadd.s32 %v1254_v6, %v243_v8  ;;  %v245_v17 = vadd.s32 104, %v1262_v10  ;;  %v292_v18 = vadd.s32 %v1254_v6, %v259_v12  ;;  %v261_v20 = vadd.s32 232, %v1262_v10 }
  0x1e   : > { %1129 = vmatpush3.bf16.msra.mxu0 %v1126_v26  ;;  %1151 = vmatpush3.bf16.msra.mxu1 %v1126_v26  ;;  %v277_v21 = vadd.s32 %v1254_v6, %v244_v13  ;;  %v293_v22 = vadd.s32 %v1254_v6, %v260_v14  ;;  %v246_v23 = vadd.s32 112, %v1262_v10  ;;  %v262_v24 = vadd.s32 240, %v1262_v10 }
  0x1f   : > { %1131 = vmatprep.subr.bf16.mxu0 %v1130_v29  ;;  %1144 = vmatprep.subr.bf16.mxu1 %v1130_v29  ;;  %v278_v25 = vadd.s32 %v1254_v6, %v245_v17  ;;  %v294_v26 = vadd.s32 %v1254_v6, %v261_v20  ;;  %v247_v27 = vadd.s32 120, %v1262_v10  ;;  %v263_v28 = vadd.s32 248, %v1262_v10  ;;  %v422_v20 = vld [vmem:[#allocation2 + $0xc8] sm:$0xff] }
  0x20   : > { %v295_v30 = vadd.s32 %v1254_v6, %v262_v24 }
  0x21   : > { %v280_v10 = vadd.s32 %v1254_v6, %v247_v27  ;;  %v296_v31 = vadd.s32 %v1254_v6, %v263_v28  ;;  %v421_v28 = vld [vmem:[#allocation2 + $0xc0] sm:$0xff] }
  0x22   : > { %1133 = vmatpush3.bf16.msra.mxu0 %v1130_v29  ;;  %1152 = vmatpush3.bf16.msra.mxu1 %v1130_v29  ;;  %v279_v29 = vadd.s32 %v1254_v6, %v246_v23  ;;  %v398_v6 = vld [vmem:[#allocation2 + $0x8] sm:$0xff] }
  0x23   : > { %1135 = vmatprep.subr.bf16.mxu0 %v1134_v34  ;;  %1145 = vmatprep.subr.bf16.mxu1 %v1134_v34 }
  0x26   : > { %1137 = vmatpush3.bf16.msra.mxu0 %v1134_v34  ;;  %1153 = vmatpush3.bf16.msra.mxu1 %v1134_v34  ;;  %v413_v34 = vld [vmem:[#allocation2 + $0x80] sm:$0xff] }
  0x29   : > { %1059 = vmatmul.mubr.msk.f32.vlgmr.msra.gmra.mrb[0].mxu0 %vm302_vm3, %v1205_v19  ;;  %1083 = vmatmul.mubr.msk.f32.vlgmr.msra.gmra.mrb[0].mxu1 %vm318_vm4, %v1205_v19  ;;  %vm325_vm3 = vcmp.eq.s32.totalorder %v289_v4, %v1302_v15  ;;  %vm310_vm4 = vcmp.eq.s32.totalorder %v274_v5, %v1302_v15  ;;  %v403_v5 = vld [vmem:[#allocation2 + $0x30] sm:$0xff] }
  0x2a   : > { %1061 = vmatprep.mubr.msk.f32.mxu0 %vm303_vm5, %v1205_v19  ;;  %1085 = vmatprep.mubr.msk.f32.mxu1 %vm319_vm6, %v1205_v19  ;;  %vm326_vm5 = vcmp.eq.s32.totalorder %v290_v7, %v1302_v15  ;;  %vm311_vm6 = vcmp.eq.s32.totalorder %v275_v9, %v1302_v15  ;;  %v419_v9 = vld [vmem:[#allocation2 + $0xb0] sm:$0xff] }
  0x2d   : > { %1062 = vmatmul.mubr.msk.f32.gmra.mrb[2].mxu0 %vm304_vm7, %v1205_v19  ;;  %1086 = vmatmul.mubr.msk.f32.gmra.mrb[2].mxu1 %vm320_vm8, %v1205_v19  ;;  %vm327_vm7 = vcmp.eq.s32.totalorder %v291_v11, %v1302_v15  ;;  %vm312_vm8 = vcmp.eq.s32.totalorder %v276_v16, %v1302_v15 }
  0x2e   : > { %1064 = vmatprep.mubr.msk.f32.mxu0 %vm305_vm9, %v1205_v19  ;;  %1088 = vmatprep.mubr.msk.f32.mxu1 %vm321_vm10, %v1205_v19  ;;  %vm328_vm9 = vcmp.eq.s32.totalorder %v292_v18, %v1302_v15  ;;  %vm313_vm10 = vcmp.eq.s32.totalorder %v277_v21, %v1302_v15  ;;  %v406_v18 = vld [vmem:[#allocation2 + $0x48] sm:$0xff] }
  0x31   : > { %1065 = vmatmul.mubr.msk.f32.gmra.mrb[4].mxu0 %vm306_vm11, %v1205_v19  ;;  %1089 = vmatmul.mubr.msk.f32.gmra.mrb[4].mxu1 %vm322_vm12, %v1205_v19  ;;  %vm329_vm11 = vcmp.eq.s32.totalorder %v293_v22, %v1302_v15  ;;  %vm314_vm12 = vcmp.eq.s32.totalorder %v278_v25, %v1302_v15  ;;  %v405_v25 = vld [vmem:[#allocation2 + $0x40] sm:$0xff] }
  0x32   : > { %1067 = vmatprep.mubr.msk.f32.mxu0 %vm307_vm13, %v1205_v19  ;;  %1091 = vmatprep.mubr.msk.f32.mxu1 %vm323_vm14, %v1205_v19  ;;  %vm330_vm13 = vcmp.eq.s32.totalorder %v294_v26, %v1302_v15  ;;  %vm315_vm14 = vcmp.eq.s32.totalorder %v279_v29, %v1302_v15 }
  0x35   : > { %1068 = vmatmul.mubr.msk.f32.gmra.mrb[6].mxu0 %vm308_vm15, %v1205_v19  ;;  %1092 = vmatmul.mubr.msk.f32.gmra.mrb[6].mxu1 %vm324_vm1, %v1205_v19  ;;  %vm331_vm15 = vcmp.eq.s32.totalorder %v295_v30, %v1302_v15  ;;  %vm316_vm1 = vcmp.eq.s32.totalorder %v280_v10, %v1302_v15 }
  0x36   : > { %1070 = vmatprep.mubr.msk.f32.mxu0 %vm309_vm2, %v1205_v19  ;;  %1094 = vmatprep.mubr.msk.f32.mxu1 %vm325_vm3, %v1205_v19  ;;  %vm332_vm2 = vcmp.eq.s32.totalorder %v296_v31, %v1302_v15 }
  0x39   : > { %1071 = vmatmul.mubr.msk.f32.gmra.mrb[8].mxu0 %vm310_vm4, %v1205_v19  ;;  %1095 = vmatmul.mubr.msk.f32.gmra.mrb[8].mxu1 %vm326_vm5, %v1205_v19 }
  0x3a   : > { %1073 = vmatprep.mubr.msk.f32.mxu0 %vm311_vm6, %v1205_v19  ;;  %1097 = vmatprep.mubr.msk.f32.mxu1 %vm327_vm7, %v1205_v19 }
  0x3d   : > { %1074 = vmatmul.mubr.msk.f32.gmra.mrb[10].mxu0 %vm312_vm8, %v1205_v19  ;;  %1098 = vmatmul.mubr.msk.f32.gmra.mrb[10].mxu1 %vm328_vm9, %v1205_v19 }
  0x3e   : > { %1076 = vmatprep.mubr.msk.f32.mxu0 %vm313_vm10, %v1205_v19  ;;  %1100 = vmatprep.mubr.msk.f32.mxu1 %vm329_vm11, %v1205_v19 }
  0x41   : > { %1077 = vmatmul.mubr.msk.f32.gmra.mrb[12].mxu0 %vm314_vm12, %v1205_v19  ;;  %1101 = vmatmul.mubr.msk.f32.gmra.mrb[12].mxu1 %vm330_vm13, %v1205_v19 }
  0x42   : > { %1079 = vmatprep.mubr.msk.f32.mxu0 %vm315_vm14, %v1205_v19  ;;  %1103 = vmatprep.mubr.msk.f32.mxu1 %vm331_vm15, %v1205_v19 }
  0x45   : > { %1080 = vmatmul.mubr.msk.f32.gmra.mrb[14].mxu0 %vm316_vm1, %v1205_v19  ;;  %1104 = vmatmul.mubr.msk.f32.gmra.mrb[14].mxu1 %vm332_vm2, %v1205_v19  ;;  %v399_v19 = vld [vmem:[#allocation2 + $0x10] sm:$0xff] }
  0xfc   : > { %v1060_v35 = vpop.f32.mrb[0].mxu0  ;;  %v1084_v36 = vpop.f32.mrb[0].mxu1 }
  0xfd   : > { %v671_v37 = vadd.f32 %v1060_v35, %v398_v6  ;;  %v687_v38 = vadd.f32 %v1084_v36, %v414_v32  ;;  %v511_v39 = vpop.f32.mrb[1].mxu0  ;;  %v591_v40 = vpop.f32.mrb[1].mxu1 }
  0xfe   : > { %v670_v41 = vadd.f32 %v511_v39, %v397_v33  ;;  %v686_v15 = vadd.f32 %v591_v40, %v413_v34  ;;  %v408_v33 = vld [vmem:[#allocation2 + $0x58] sm:$0xff]  ;;  %v407_v39 = vld [vmem:[#allocation2 + $0x50] sm:$0xff] }
  0xff   : > { %704 = vst.msk [vmem:[#allocation2 + $0x8] sm:$0xff] %vm194_vm0, %v671_v37  ;;  %720 = vst.msk [vmem:[#allocation2 + $0x88] sm:$0xff] %vm194_vm0, %v687_v38  ;;  %v424_v34 = vld [vmem:[#allocation2 + $0xd8] sm:$0xff] }
 0x100   : > { %703 = vst.msk [vmem:[#allocation2] sm:$0xff] %vm194_vm0, %v670_v41  ;;  %719 = vst.msk [vmem:[#allocation2 + $0x80] sm:$0xff] %vm194_vm0, %v686_v15  ;;  %v1063_v45 = vpop.f32.mrb[2].mxu0  ;;  %v1087_v46 = vpop.f32.mrb[2].mxu1  ;;  %v423_v15 = vld [vmem:[#allocation2 + $0xd0] sm:$0xff] }
 0x101   : > { %v673_v47 = vadd.f32 %v1063_v45, %v400_v42  ;;  %v689_v48 = vadd.f32 %v1087_v46, %v416_v43  ;;  %v521_v49 = vpop.f32.mrb[3].mxu0  ;;  %v601_v50 = vpop.f32.mrb[3].mxu1 }
 0x102   : > { %v672_v51 = vadd.f32 %v521_v49, %v399_v19  ;;  %v688_v52 = vadd.f32 %v601_v50, %v415_v44 }
 0x103   : > { %706 = vst.msk [vmem:[#allocation2 + $0x18] sm:$0xff] %vm194_vm0, %v673_v47  ;;  %722 = vst.msk [vmem:[#allocation2 + $0x98] sm:$0xff] %vm194_vm0, %v689_v48  ;;  %v410_v47 = vld [vmem:[#allocation2 + $0x68] sm:$0xff] }
 0x104   : > { %705 = vst.msk [vmem:[#allocation2 + $0x10] sm:$0xff] %vm194_vm0, %v672_v51  ;;  %721 = vst.msk [vmem:[#allocation2 + $0x90] sm:$0xff] %vm194_vm0, %v688_v52  ;;  %v1066_v57 = vpop.f32.mrb[4].mxu0  ;;  %v1090_v58 = vpop.f32.mrb[4].mxu1  ;;  %v426_v48 = vld [vmem:[#allocation2 + $0xe8] sm:$0xff] }
 0x105   : > { %v675_v59 = vadd.f32 %v1066_v57, %v402_v53  ;;  %v691_v60 = vadd.f32 %v1090_v58, %v418_v54  ;;  %v531_v61 = vpop.f32.mrb[5].mxu0  ;;  %v611_v62 = vpop.f32.mrb[5].mxu1  ;;  %v409_v53 = vld [vmem:[#allocation2 + $0x60] sm:$0xff] }
 0x106   : > { %v739_v1 = vld [vmem:[#allocation2 + $0x8] sm:$0xff]  ;;  %v674_v3 = vadd.f32 %v531_v61, %v401_v55  ;;  %v690_v4 = vadd.f32 %v611_v62, %v417_v56  ;;  %v425_v56 = vld [vmem:[#allocation2 + $0xe0] sm:$0xff] }
 0x107   : > { %v755_v2 = vld [vmem:[#allocation2 + $0x88] sm:$0xff]  ;;  %771 = vst.msk [vmem:[%s1473_s27 + $0x8] sm:$0xff] %vm194_vm0, %v739_v1  ;;  %v738_v7 = vld [vmem:[#allocation2] sm:$0xff]  ;;  %708 = vst.msk [vmem:[#allocation2 + $0x28] sm:$0xff] %vm194_vm0, %v675_v59 }
 0x108   : > { %787 = vst.msk [vmem:[%s1473_s27 + $0x88] sm:$0xff] %vm194_vm0, %v755_v2  ;;  %v754_v8 = vld [vmem:[#allocation2 + $0x80] sm:$0xff]  ;;  %724 = vst.msk [vmem:[#allocation2 + $0xa8] sm:$0xff] %vm194_vm0, %v691_v60  ;;  %v1069_v11 = vpop.f32.mrb[6].mxu0  ;;  %v1093_v12 = vpop.f32.mrb[6].mxu1 }
 0x109   : > { %770 = vst.msk [vmem:[%s1473_s27] sm:$0xff] %vm194_vm0, %v738_v7  ;;  %786 = vst.msk [vmem:[%s1473_s27 + $0x80] sm:$0xff] %vm194_vm0, %v754_v8  ;;  %v677_v13 = vadd.f32 %v1069_v11, %v404_v63  ;;  %v693_v14 = vadd.f32 %v1093_v12, %v420_v0  ;;  %v541_v16 = vpop.f32.mrb[7].mxu0  ;;  %v621_v17 = vpop.f32.mrb[7].mxu1  ;;  %v412_v63 = vld [vmem:[#allocation2 + $0x78] sm:$0xff] }
 0x10a   : > { %707 = vst.msk [vmem:[#allocation2 + $0x20] sm:$0xff] %vm194_vm0, %v674_v3  ;;  %723 = vst.msk [vmem:[#allocation2 + $0xa0] sm:$0xff] %vm194_vm0, %v690_v4  ;;  %v741_v21 = vld [vmem:[#allocation2 + $0x18] sm:$0xff]  ;;  %v676_v23 = vadd.f32 %v541_v16, %v403_v5  ;;  %v692_v24 = vadd.f32 %v621_v17, %v419_v9  ;;  %v411_v5 = vld [vmem:[#allocation2 + $0x70] sm:$0xff] }
 0x10b   : > { %v757_v22 = vld [vmem:[#allocation2 + $0x98] sm:$0xff]  ;;  %773 = vst.msk [vmem:[%s1473_s27 + $0x18] sm:$0xff] %vm194_vm0, %v741_v21  ;;  %v740_v26 = vld [vmem:[#allocation2 + $0x10] sm:$0xff]  ;;  %710 = vst.msk [vmem:[#allocation2 + $0x38] sm:$0xff] %vm194_vm0, %v677_v13 }
 0x10c   : > { %789 = vst.msk [vmem:[%s1473_s27 + $0x98] sm:$0xff] %vm194_vm0, %v757_v22  ;;  %v756_v27 = vld [vmem:[#allocation2 + $0x90] sm:$0xff]  ;;  %726 = vst.msk [vmem:[#allocation2 + $0xb8] sm:$0xff] %vm194_vm0, %v693_v14  ;;  %v1072_v29 = vpop.f32.mrb[8].mxu0  ;;  %v1096_v30 = vpop.f32.mrb[8].mxu1  ;;  %v428_v0 = vld [vmem:[#allocation2 + $0xf8] sm:$0xff] }
 0x10d   : > { %772 = vst.msk [vmem:[%s1473_s27 + $0x10] sm:$0xff] %vm194_vm0, %v740_v26  ;;  %788 = vst.msk [vmem:[%s1473_s27 + $0x90] sm:$0xff] %vm194_vm0, %v756_v27  ;;  %v679_v10 = vadd.f32 %v1072_v29, %v406_v18  ;;  %v695_v31 = vadd.f32 %v1096_v30, %v422_v20  ;;  %v551_v6 = vpop.f32.mrb[9].mxu0  ;;  %v631_v32 = vpop.f32.mrb[9].mxu1  ;;  %v427_v9 = vld [vmem:[#allocation2 + $0xf0] sm:$0xff] }
 0x10e   : > { %709 = vst.msk [vmem:[#allocation2 + $0x30] sm:$0xff] %vm194_vm0, %v676_v23  ;;  %725 = vst.msk [vmem:[#allocation2 + $0xb0] sm:$0xff] %vm194_vm0, %v692_v24  ;;  %v743_v35 = vld [vmem:[#allocation2 + $0x28] sm:$0xff]  ;;  %v678_v37 = vadd.f32 %v551_v6, %v405_v25  ;;  %v694_v38 = vadd.f32 %v631_v32, %v421_v28 }
 0x10f   : > { %v759_v36 = vld [vmem:[#allocation2 + $0xa8] sm:$0xff]  ;;  %775 = vst.msk [vmem:[%s1473_s27 + $0x28] sm:$0xff] %vm194_vm0, %v743_v35  ;;  %712 = vst.msk [vmem:[#allocation2 + $0x48] sm:$0xff] %vm194_vm0, %v679_v10 }
 0x110   : > { %791 = vst.msk [vmem:[%s1473_s27 + $0xa8] sm:$0xff] %vm194_vm0, %v759_v36  ;;  %728 = vst.msk [vmem:[#allocation2 + $0xc8] sm:$0xff] %vm194_vm0, %v695_v31  ;;  %v1075_v42 = vpop.f32.mrb[10].mxu0  ;;  %v1099_v43 = vpop.f32.mrb[10].mxu1 }
 0x111   : > { %v742_v40 = vld [vmem:[#allocation2 + $0x20] sm:$0xff]  ;;  %711 = vst.msk [vmem:[#allocation2 + $0x40] sm:$0xff] %vm194_vm0, %v678_v37  ;;  %727 = vst.msk [vmem:[#allocation2 + $0xc0] sm:$0xff] %vm194_vm0, %v694_v38  ;;  %v681_v19 = vadd.f32 %v1075_v42, %v408_v33  ;;  %v697_v44 = vadd.f32 %v1099_v43, %v424_v34  ;;  %v561_v45 = vpop.f32.mrb[11].mxu0  ;;  %v641_v46 = vpop.f32.mrb[11].mxu1 }
 0x112   : > { %v758_v41 = vld [vmem:[#allocation2 + $0xa0] sm:$0xff]  ;;  %774 = vst.msk [vmem:[%s1473_s27 + $0x20] sm:$0xff] %vm194_vm0, %v742_v40  ;;  %v745_v49 = vld [vmem:[#allocation2 + $0x38] sm:$0xff]  ;;  %v680_v51 = vadd.f32 %v561_v45, %v407_v39  ;;  %v696_v52 = vadd.f32 %v641_v46, %v423_v15 }
 0x113   : > { %790 = vst.msk [vmem:[%s1473_s27 + $0xa0] sm:$0xff] %vm194_vm0, %v758_v41  ;;  %v761_v50 = vld [vmem:[#allocation2 + $0xb8] sm:$0xff]  ;;  %777 = vst.msk [vmem:[%s1473_s27 + $0x38] sm:$0xff] %vm194_vm0, %v745_v49 }
 0x114   : > { %793 = vst.msk [vmem:[%s1473_s27 + $0xb8] sm:$0xff] %vm194_vm0, %v761_v50  ;;  %714 = vst.msk [vmem:[#allocation2 + $0x58] sm:$0xff] %vm194_vm0, %v681_v19  ;;  %v1078_v57 = vpop.f32.mrb[12].mxu0  ;;  %v1102_v58 = vpop.f32.mrb[12].mxu1 }
 0x115   : > { %v744_v54 = vld [vmem:[#allocation2 + $0x30] sm:$0xff]  ;;  %730 = vst.msk [vmem:[#allocation2 + $0xd8] sm:$0xff] %vm194_vm0, %v697_v44  ;;  %713 = vst.msk [vmem:[#allocation2 + $0x50] sm:$0xff] %vm194_vm0, %v680_v51  ;;  %v683_v59 = vadd.f32 %v1078_v57, %v410_v47  ;;  %v699_v60 = vadd.f32 %v1102_v58, %v426_v48  ;;  %v571_v61 = vpop.f32.mrb[13].mxu0  ;;  %v651_v62 = vpop.f32.mrb[13].mxu1 }
 0x116   : > { %v760_v55 = vld [vmem:[#allocation2 + $0xb0] sm:$0xff]  ;;  %776 = vst.msk [vmem:[%s1473_s27 + $0x30] sm:$0xff] %vm194_vm0, %v744_v54  ;;  %729 = vst.msk [vmem:[#allocation2 + $0xd0] sm:$0xff] %vm194_vm0, %v696_v52  ;;  %v747_v1 = vld [vmem:[#allocation2 + $0x48] sm:$0xff]  ;;  %v682_v3 = vadd.f32 %v571_v61, %v409_v53  ;;  %v698_v4 = vadd.f32 %v651_v62, %v425_v56 }
 0x117   : > { %792 = vst.msk [vmem:[%s1473_s27 + $0xb0] sm:$0xff] %vm194_vm0, %v760_v55  ;;  %v763_v2 = vld [vmem:[#allocation2 + $0xc8] sm:$0xff]  ;;  %779 = vst.msk [vmem:[%s1473_s27 + $0x48] sm:$0xff] %vm194_vm0, %v747_v1 }
 0x118   : > { %795 = vst.msk [vmem:[%s1473_s27 + $0xc8] sm:$0xff] %vm194_vm0, %v763_v2  ;;  %v746_v7 = vld [vmem:[#allocation2 + $0x40] sm:$0xff]  ;;  %716 = vst.msk [vmem:[#allocation2 + $0x68] sm:$0xff] %vm194_vm0, %v683_v59  ;;  %v1081_v11 = vpop.f32.mrb[14].mxu0  ;;  %v1105_v12 = vpop.f32.mrb[14].mxu1 }
 0x119   : > { %v762_v8 = vld [vmem:[#allocation2 + $0xc0] sm:$0xff]  ;;  %732 = vst.msk [vmem:[#allocation2 + $0xe8] sm:$0xff] %vm194_vm0, %v699_v60  ;;  %778 = vst.msk [vmem:[%s1473_s27 + $0x40] sm:$0xff] %vm194_vm0, %v746_v7  ;;  %v685_v13 = vadd.f32 %v1081_v11, %v412_v63  ;;  %v701_v14 = vadd.f32 %v1105_v12, %v428_v0  ;;  %v581_v16 = vpop.f32.mrb[15].mxu0  ;;  %v661_v17 = vpop.f32.mrb[15].mxu1 }
 0x11a   : > { %794 = vst.msk [vmem:[%s1473_s27 + $0xc0] sm:$0xff] %vm194_vm0, %v762_v8  ;;  %715 = vst.msk [vmem:[#allocation2 + $0x60] sm:$0xff] %vm194_vm0, %v682_v3  ;;  %v684_v21 = vadd.f32 %v581_v16, %v411_v5  ;;  %v700_v22 = vadd.f32 %v661_v17, %v427_v9 }
 0x11b   : > { %731 = vst.msk [vmem:[#allocation2 + $0xe0] sm:$0xff] %vm194_vm0, %v698_v4  ;;  %v749_v18 = vld [vmem:[#allocation2 + $0x58] sm:$0xff]  ;;  %718 = vst.msk [vmem:[#allocation2 + $0x78] sm:$0xff] %vm194_vm0, %v685_v13 }
 0x11c   : > { %v765_v20 = vld [vmem:[#allocation2 + $0xd8] sm:$0xff]  ;;  %781 = vst.msk [vmem:[%s1473_s27 + $0x58] sm:$0xff] %vm194_vm0, %v749_v18  ;;  %v748_v23 = vld [vmem:[#allocation2 + $0x50] sm:$0xff]  ;;  %734 = vst.msk [vmem:[#allocation2 + $0xf8] sm:$0xff] %vm194_vm0, %v701_v14 }
 0x11d   : > { %797 = vst.msk [vmem:[%s1473_s27 + $0xd8] sm:$0xff] %vm194_vm0, %v765_v20  ;;  %v764_v24 = vld [vmem:[#allocation2 + $0xd0] sm:$0xff]  ;;  %780 = vst.msk [vmem:[%s1473_s27 + $0x50] sm:$0xff] %vm194_vm0, %v748_v23 }
 0x11e   : > { %796 = vst.msk [vmem:[%s1473_s27 + $0xd0] sm:$0xff] %vm194_vm0, %v764_v24  ;;  %717 = vst.msk [vmem:[#allocation2 + $0x70] sm:$0xff] %vm194_vm0, %v684_v21 }
 0x11f   : > { %733 = vst.msk [vmem:[#allocation2 + $0xf0] sm:$0xff] %vm194_vm0, %v700_v22  ;;  %v751_v25 = vld [vmem:[#allocation2 + $0x68] sm:$0xff] }
 0x120   : > { %v767_v26 = vld [vmem:[#allocation2 + $0xe8] sm:$0xff]  ;;  %783 = vst.msk [vmem:[%s1473_s27 + $0x68] sm:$0xff] %vm194_vm0, %v751_v25 }
 0x121   : > { %799 = vst.msk [vmem:[%s1473_s27 + $0xe8] sm:$0xff] %vm194_vm0, %v767_v26  ;;  %v750_v27 = vld [vmem:[#allocation2 + $0x60] sm:$0xff] }
 0x122   : > { %v766_v28 = vld [vmem:[#allocation2 + $0xe0] sm:$0xff]  ;;  %782 = vst.msk [vmem:[%s1473_s27 + $0x60] sm:$0xff] %vm194_vm0, %v750_v27  ;;  %v753_v29 = vld [vmem:[#allocation2 + $0x78] sm:$0xff] }
 0x123   : > { %798 = vst.msk [vmem:[%s1473_s27 + $0xe0] sm:$0xff] %vm194_vm0, %v766_v28  ;;  %v769_v30 = vld [vmem:[#allocation2 + $0xf8] sm:$0xff]  ;;  %785 = vst.msk [vmem:[%s1473_s27 + $0x78] sm:$0xff] %vm194_vm0, %v753_v29 }
 0x124   : > { %801 = vst.msk [vmem:[%s1473_s27 + $0xf8] sm:$0xff] %vm194_vm0, %v769_v30 }
 0x125   : > { %v752_v10 = vld [vmem:[#allocation2 + $0x70] sm:$0xff] }
 0x126   : > { %v768_v31 = vld [vmem:[#allocation2 + $0xf0] sm:$0xff]  ;;  %784 = vst.msk [vmem:[%s1473_s27 + $0x70] sm:$0xff] %vm194_vm0, %v752_v10 }
 0x127   : > { %800 = vst.msk [vmem:[%s1473_s27 + $0xf0] sm:$0xff] %vm194_vm0, %v768_v31 }
 0x128 PF: > { %s12_s11 = sadd.s32 1, %s1202_s11   ;;  %s1577_s9 = smov %s1198_s10 }
 0x129   : > { %p9_p5 = scmp.ge.s32.totalorder %s12_s11, 4   ;;  %s1578_s10 = smov %s1580_s12 }
 0x12b   :  { %11 = sbr.rel (!%p9_p5) target bundleno = 2 (0x2), region = 69 }

</bundles_post_ra>
